<compile_context>
chip_gen: v6e
topology: v6e:2x2x1
jax: 0.10.0
libtpu: 0.0.40
codegen_flags: <defaults>
</compile_context>

<pallas_src>
import jax
import jax.numpy as jnp
from jax import lax
from jax.experimental import pallas as pl
from jax.experimental.pallas import tpu as pltpu

_NEG_LARGE = -1e30  # bias for padded class rows -> exp() == 0 in the softmax
_SUBLANES = 8
_LANES = 128


def _predictor_kernel(xt_ref, w1_ref, b1_ref, w2_ref, b2_ref, out_ref):
    # xt_ref : (input_dim, TB)           -- x^T tile (batch on lanes)
    # w1_ref : (hidden, input_dim)       -- PyTorch layout, used as LHS
    # b1_ref : (hidden, 1)
    # w2_ref : (padded_classes, hidden)  -- padded rows are zero
    # b2_ref : (padded_classes, 1)       -- padded rows are -1e30
    # out_ref: (padded_classes, TB)

    # fc1 + ReLU:  h^T = W1 @ x^T + b1   -> (hidden, TB)
    ht = lax.dot_general(
        w1_ref[...], xt_ref[...],
        dimension_numbers=(((1,), (0,)), ((), ())),
        preferred_element_type=jnp.float32,
    )
    ht = jnp.maximum(ht + b1_ref[...], 0.0)

    # fc2:  logits^T = W2p @ h^T + b2p   -> (padded_classes, TB)
    logits = lax.dot_general(
        w2_ref[...], ht,
        dimension_numbers=(((1,), (0,)), ((), ())),
        preferred_element_type=jnp.float32,
    ) + b2_ref[...]

    # Numerically stable softmax over the class (sublane) axis.  Padded class
    # rows hold -1e30 logits, contributing exp() == 0 to the denominator.
    m = jnp.max(logits, axis=0, keepdims=True)
    e = jnp.exp(logits - m)
    denom = jnp.sum(e, axis=0, keepdims=True)
    out_ref[...] = (e * pl.reciprocal(denom)).astype(out_ref.dtype)


def _round_up(x, m):
    return ((x + m - 1) // m) * m


def _pick_batch_tile(batch, block_batch):
    """Batch tile: big enough to amortize per-step overhead, >=2 grid steps
    for megacore when the batch is non-trivial, lane-aligned when tiled."""
    if batch <= 256:
        return batch                                   # single (full-dim) block
    half = _round_up(pl.cdiv(batch, 2), _LANES)        # guarantees >=2 steps
    return min(block_batch, half)


def make_adversary_action_predictor(w1, b1, w2, b2, *, block_batch=4096):
    """Pack parameters once (PyTorch nn.Linear layout: (out, in) / (out,))
    and return a jitted predict(x) computing the module's forward pass."""
    w1f = jnp.asarray(w1, jnp.float32)                 # (hidden, input_dim)
    b1f = jnp.asarray(b1, jnp.float32)[:, None]        # (hidden, 1)
    hidden, input_dim = w1f.shape
    num_classes = w2.shape[0]

    # Pad classes to one sublane group (3 -> 8); padded rows: zero weights,
    # -1e30 bias, masked out of the softmax before the sum.
    padded_classes = _round_up(num_classes, _SUBLANES)
    w2p = jnp.zeros((padded_classes, hidden), jnp.float32)
    w2p = w2p.at[:num_classes, :].set(jnp.asarray(w2, jnp.float32))
    b2p = jnp.full((padded_classes, 1), _NEG_LARGE, jnp.float32)
    b2p = b2p.at[:num_classes, 0].set(jnp.asarray(b2, jnp.float32))

    def predict(x):
        x = jnp.asarray(x, jnp.float32)
        batch = x.shape[0]
        xt = x.T                                       # (input_dim, batch)

        tb = _pick_batch_tile(batch, block_batch)
        grid = (pl.cdiv(batch, tb),)

        # VMEM budget: double-buffered xT/out tiles + resident params +
        # intermediate (hidden, TB) / (padded_classes, TB) live values.
        params_bytes = 4 * (hidden * input_dim + hidden
                            + padded_classes * hidden + padded_classes)
        est_bytes = (4 * tb * (2 * input_dim + 2 * padded_classes
                               + hidden + 2 * padded_classes)
                     + 2 * params_bytes)
        vmem_limit = min(48 * 1024 * 1024, max(16 * 1024 * 1024, 2 * est_bytes))

        out_t = pl.pallas_call(
            _predictor_kernel,
            out_shape=jax.ShapeDtypeStruct((padded_classes, batch), jnp.float32),
            grid=grid,
            in_specs=[
                pl.BlockSpec((input_dim, tb), lambda i: (0, i)),          # x^T tile
                pl.BlockSpec((hidden, input_dim), lambda i: (0, 0)),      # W1
                pl.BlockSpec((hidden, 1), lambda i: (0, 0)),              # b1
                pl.BlockSpec((padded_classes, hidden), lambda i: (0, 0)), # W2 (padded)
                pl.BlockSpec((padded_classes, 1), lambda i: (0, 0)),      # b2 (padded)
            ],
            out_specs=pl.BlockSpec((padded_classes, tb), lambda i: (0, i)),
            compiler_params=pltpu.CompilerParams(
                dimension_semantics=("parallel",),
                vmem_limit_bytes=vmem_limit,
            ),
        )(xt, w1f, b1f, w2p, b2p)

        # Back to the module's (batch, num_classes) orientation.
        return out_t[:num_classes, :].T

    return jax.jit(predict)


def adversary_action_predictor(x, w1, b1, w2, b2, *, block_batch=4096):
    """One-shot convenience wrapper (packs params on every call)."""
    return make_adversary_action_predictor(
        w1, b1, w2, b2, block_batch=block_batch)(x)


if __name__ == "__main__":
    # Small shapes consistent with the module's forward.
    batch, input_dim, hidden_dim, num_classes = 8, 16, 32, 3

    key = jax.random.PRNGKey(0)
    kx, kw1, kb1, kw2, kb2 = jax.random.split(key, 5)

    x = jax.random.normal(kx, (batch, input_dim), dtype=jnp.float32)
    # PyTorch nn.Linear parameter shapes: (out, in) and (out,)
    w1 = jax.random.normal(kw1, (hidden_dim, input_dim), dtype=jnp.float32) * 0.1
    b1 = jax.random.normal(kb1, (hidden_dim,), dtype=jnp.float32) * 0.1
    w2 = jax.random.normal(kw2, (num_classes, hidden_dim), dtype=jnp.float32) * 0.1
    b2 = jax.random.normal(kb2, (num_classes,), dtype=jnp.float32) * 0.1

    predict = make_adversary_action_predictor(w1, b1, w2, b2)
    out = jax.block_until_ready(predict(x))

    # Reference check in plain JAX (same math as the PyTorch module).
    h_ref = jnp.maximum(x @ w1.T + b1, 0.0)
    logits_ref = h_ref @ w2.T + b2
    ref = jax.nn.softmax(logits_ref, axis=1)

    assert out.shape == (batch, num_classes)
    assert jnp.allclose(out, ref, atol=1e-5, rtol=1e-5)
    assert jnp.allclose(jnp.sum(out, axis=1), 1.0, atol=1e-5)

    print("KERNEL_OK")
</pallas_src>

<mosaic_0001>
module attributes {stable_mosaic.version = 11 : i64} {
  func.func @_predictor_kernel(%arg0: i32, %arg1: memref<16x8xf32, #tpu.memory_space<vmem>>, %arg2: memref<32x16xf32, #tpu.memory_space<vmem>>, %arg3: memref<32x1xf32, #tpu.memory_space<vmem>>, %arg4: memref<8x32xf32, #tpu.memory_space<vmem>>, %arg5: memref<8x1xf32, #tpu.memory_space<vmem>>, %arg6: memref<8x8xf32, #tpu.memory_space<vmem>>) attributes {dimension_semantics = [#tpu.dimension_semantics<parallel>], iteration_bounds = array<i64: 1>, scalar_prefetch = 0 : i64, scratch_operands = 0 : i64, tpu.core_type = #tpu.core_type<tc>, window_params = [{transform_indices = @transform_0, window_bounds = array<i64: 16, 8>}, {pipeline_mode = #tpu.pipeline_mode<synchronous>, transform_indices = @transform_1, window_bounds = array<i64: 32, 16>}, {pipeline_mode = #tpu.pipeline_mode<synchronous>, transform_indices = @transform_2, window_bounds = array<i64: 32, 1>}, {pipeline_mode = #tpu.pipeline_mode<synchronous>, transform_indices = @transform_3, window_bounds = array<i64: 8, 32>}, {pipeline_mode = #tpu.pipeline_mode<synchronous>, transform_indices = @transform_4, window_bounds = array<i64: 8, 1>}, {transform_indices = @transform_5, window_bounds = array<i64: 8, 8>}]} {
    %c0 = arith.constant 0 : index
    %c0_0 = arith.constant 0 : index
    %0 = vector.load %arg2[%c0, %c0_0] : memref<32x16xf32, #tpu.memory_space<vmem>>, vector<32x16xf32>
    %c0_1 = arith.constant 0 : index
    %c0_2 = arith.constant 0 : index
    %1 = vector.load %arg1[%c0_1, %c0_2] : memref<16x8xf32, #tpu.memory_space<vmem>>, vector<16x8xf32>
    %cst = arith.constant dense<0.000000e+00> : vector<32x8xf32>
    %2 = tpu.matmul %0, %1, %cst {dimension_numbers = #tpu.dot_dimension_numbers<[1], [0], [0], [1], [0, 0, 1, 1], [], []>} : vector<32x16xf32>, vector<16x8xf32>, vector<32x8xf32> -> vector<32x8xf32>
    %c0_3 = arith.constant 0 : index
    %c0_4 = arith.constant 0 : index
    %3 = vector.load %arg3[%c0_3, %c0_4] : memref<32x1xf32, #tpu.memory_space<vmem>>, vector<32x1xf32>
    %4 = vector.broadcast %3 : vector<32x1xf32> to vector<32x8xf32>
    %5 = arith.addf %2, %4 : vector<32x8xf32>
    %cst_5 = arith.constant 0.000000e+00 : f32
    %6 = vector.broadcast %cst_5 : f32 to vector<32x8xf32>
    %7 = arith.maximumf %5, %6 : vector<32x8xf32>
    %c0_6 = arith.constant 0 : index
    %c0_7 = arith.constant 0 : index
    %8 = vector.load %arg4[%c0_6, %c0_7] : memref<8x32xf32, #tpu.memory_space<vmem>>, vector<8x32xf32>
    %cst_8 = arith.constant dense<0.000000e+00> : vector<8x8xf32>
    %9 = tpu.matmul %8, %7, %cst_8 {dimension_numbers = #tpu.dot_dimension_numbers<[1], [0], [0], [1], [0, 0, 1, 1], [], []>} : vector<8x32xf32>, vector<32x8xf32>, vector<8x8xf32> -> vector<8x8xf32>
    %c0_9 = arith.constant 0 : index
    %c0_10 = arith.constant 0 : index
    %10 = vector.load %arg5[%c0_9, %c0_10] : memref<8x1xf32, #tpu.memory_space<vmem>>, vector<8x1xf32>
    %11 = vector.broadcast %10 : vector<8x1xf32> to vector<8x8xf32>
    %12 = arith.addf %9, %11 : vector<8x8xf32>
    %cst_11 = arith.constant dense<0xFF800000> : vector<8xf32>
    %13 = vector.multi_reduction <maximumf>, %12, %cst_11 [0] : vector<8x8xf32> to vector<8xf32>
    %14 = vector.shape_cast %13 : vector<8xf32> to vector<1x8xf32>
    %15 = vector.broadcast %14 : vector<1x8xf32> to vector<8x8xf32>
    %16 = arith.subf %12, %15 : vector<8x8xf32>
    %17 = math.exp %16 : vector<8x8xf32>
    %cst_12 = arith.constant dense<0.000000e+00> : vector<8xf32>
    %18 = vector.multi_reduction <add>, %17, %cst_12 [0] : vector<8x8xf32> to vector<8xf32>
    %19 = vector.shape_cast %18 : vector<8xf32> to vector<1x8xf32>
    %20 = tpu.reciprocal %19 : vector<1x8xf32> -> vector<1x8xf32>
    %21 = vector.broadcast %20 : vector<1x8xf32> to vector<8x8xf32>
    %22 = arith.mulf %17, %21 : vector<8x8xf32>
    %c0_13 = arith.constant 0 : index
    %c0_14 = arith.constant 0 : index
    %23 = vector.load %arg6[%c0_13, %c0_14] : memref<8x8xf32, #tpu.memory_space<vmem>>, vector<8x8xf32>
    tpu.vector_store %arg6[%c0_13, %c0_14], %22 {strides = array<i32>} : memref<8x8xf32, #tpu.memory_space<vmem>>, vector<8x8xf32>,
    return
  }
  func.func @transform_0(%arg0: i32) -> (i32, i32) {
    %c0_i32 = arith.constant 0 : i32
    %c0_i32_0 = arith.constant 0 : i32
    return %c0_i32, %arg0 : i32, i32
  }
  func.func @transform_1(%arg0: i32) -> (i32, i32) {
    %c0_i32 = arith.constant 0 : i32
    %c0_i32_0 = arith.constant 0 : i32
    %c0_i32_1 = arith.constant 0 : i32
    return %c0_i32, %c0_i32_0 : i32, i32
  }
  func.func @transform_2(%arg0: i32) -> (i32, i32) {
    %c0_i32 = arith.constant 0 : i32
    %c0_i32_0 = arith.constant 0 : i32
    %c0_i32_1 = arith.constant 0 : i32
    return %c0_i32, %c0_i32_0 : i32, i32
  }
  func.func @transform_3(%arg0: i32) -> (i32, i32) {
    %c0_i32 = arith.constant 0 : i32
    %c0_i32_0 = arith.constant 0 : i32
    %c0_i32_1 = arith.constant 0 : i32
    return %c0_i32, %c0_i32_0 : i32, i32
  }
  func.func @transform_4(%arg0: i32) -> (i32, i32) {
    %c0_i32 = arith.constant 0 : i32
    %c0_i32_0 = arith.constant 0 : i32
    %c0_i32_1 = arith.constant 0 : i32
    return %c0_i32, %c0_i32_0 : i32, i32
  }
  func.func @transform_5(%arg0: i32) -> (i32, i32) {
    %c0_i32 = arith.constant 0 : i32
    %c0_i32_0 = arith.constant 0 : i32
    return %c0_i32, %arg0 : i32, i32
  }
}

</mosaic_0001>

<bundles_post_ra>
// kernel: predict.1
= control target key start
LH: loop header
LB: loop body
LE: loop exit
PB: predicated region body
PF: predicated region fallthrough
CT: control target
= control target key end

     0   :  { %10 = vsyncpa [#allocation3], 0  ;;  %s447_s0 = inlined_call_operand.vmem [shape: f32[16,8], index: 0, kind: input, shape index: {}]   ;;  %s448_s1 = inlined_call_operand.hbm [shape: f32[32,16], index: 1, kind: input, shape index: {}]   ;;  %s449_s2 = inlined_call_operand.hbm [shape: f32[32,1], index: 2, kind: input, shape index: {}]   ;;  %s450_s3 = inlined_call_operand.vmem [shape: f32[8,32], index: 3, kind: input, shape index: {}]   ;;  %s451_s4 = inlined_call_operand.vmem [shape: f32[8,1], index: 4, kind: input, shape index: {}]   ;;  %s452_s5 = inlined_call_operand.vmem [shape: f32[8,8], index: 5, kind: output, shape index: {}]  }
   0x1   :  { %11 = vsyncpa [#allocation5], 0  ;;  %s382_s18 = smov [#allocation2]  }
   0x2   :  { %s19_s19 = sshll.u32 %s382_s18, 4  ;;  %s20_s19 = int_to_ptr.vmem [resolvable:$true] %s19_s19 }
   0x3   :  { %s346_s20 = scalar_lea.vmem %s20_s19, 512  ;;  %p351_p1 = scmp.lt.s32.totalorder %s20_s19, %s20_s19 }
   0x4   :  { %p347_p0 = scmp.ne.s32.totalorder %s20_s19, %s346_s20  ;;  %p352_p2 = scmp.lt.s32.totalorder %s346_s20, %s346_s20 }
   0x6   :  { %p353_p3 = por %p352_p2, %p351_p1 }
   0x8   :  { %p354_p4 = pnand %p353_p3, %p347_p0 }
   0xa   :  { %357 = shalt.err (!%p354_p4)
}
   0xb   :  { %s383_s21 = smov 128   ;;  %s384_s22 = smov 8  }
   0xc   :  { %25 = dma.hbm_to_vmem [thread:$0]  %s448_s1, 512, %s20_s19, [#allocation3], %s383_s21, %s383_s21, %s384_s22  }
   0xd   :  { %s385_s25 = smov [#allocation4]  }
   0xe   :  { %s31_s26 = sshll.u32 %s385_s25, 4  ;;  %s32_s26 = int_to_ptr.vmem [resolvable:$true] %s31_s26 }
   0xf   :  { %s366_s27 = scalar_lea.vmem %s32_s26, 512  ;;  %p371_p6 = scmp.lt.s32.totalorder %s32_s26, %s32_s26 }
  0x10   :  { %p367_p5 = scmp.ne.s32.totalorder %s32_s26, %s366_s27  ;;  %p372_p7 = scmp.lt.s32.totalorder %s366_s27, %s366_s27 }
  0x12   :  { %p373_p8 = por %p372_p7, %p371_p6 }
  0x14   :  { %p374_p9 = pnand %p373_p8, %p367_p5 }
  0x16   :  { %377 = shalt.err (!%p374_p9)
}
  0x17   :  { %37 = dma.hbm_to_vmem [thread:$0]  %s449_s2, 512, %s32_s26, [#allocation5], %s383_s21, %s383_s21, %s384_s22  }
  0x18   :  { %378 = dma.done.wait [#allocation3], 512  }
  0x19   :  { %379 = vsyncadd [#allocation3], 4294966784 }
  0x1a   :  { %380 = dma.done.wait [#allocation5], 512  }
  0x1b   :  { %381 = vsyncadd [#allocation5], 4294966784  ;;  %v386_v0 = vmov 0   ;;  %vm78_vm0 = vcmask 130048   ;;  %v53_v1 = vld [vmem:[%s447_s0 + $0x8] sm:$0xff]  ;;  %v52_v2 = vld [vmem:[%s447_s0] sm:$0xff] }
  0x1c   :  { %332 = vset.pattern.permute.xlu0 %v386_v0  ;;  %333 = vset.pattern.permute.xlu1 %v386_v0  ;;  %v48_v3 = vld [vmem:[#allocation2] sm:$0xff]  ;;  %v49_v4 = vld [vmem:[#allocation2 + $0x8] sm:$0xff]  ;;  %v57_v5 = vld [vmem:[#allocation4 + $0x18] sm:$0xff]  ;;  %v387_v12 = vmov 0.0   ;;  %vm388_vm1 = vmmov 0   ;;  %vm187_vm2 = vcmask 261120  }
  0x1d   :  { %304 = vmatprep.subr.mxu0 %v53_v1  ;;  %308 = vmatprep.mubr.msk.f32.mxu0 %vm78_vm0, %v48_v3  ;;  %v55_v6 = vld [vmem:[#allocation4 + $0x8] sm:$0xff]  ;;  %v50_v7 = vld [vmem:[#allocation2 + $0x10] sm:$0xff]  ;;  %v54_v9 = vld [vmem:[#allocation4] sm:$0xff]  ;;  %vm261_vm3 = vcmask 64512  }
  0x1e   :  { %305 = vmatpush3.msra.mxu0 %v53_v1  ;;  %75 = vperm.xlu0 %332, %v57_v5   ;;  %v56_v8 = vld [vmem:[#allocation4 + $0x10] sm:$0xff]  ;;  %v51_v10 = vld [vmem:[#allocation2 + $0x18] sm:$0xff]  ;;  %v181_v11 = vld [vmem:[%s451_s4] sm:$0xff] }
  0x1f   :  { %306 = vmatprep.subr.mxu0 %v52_v2  ;;  %65 = vperm.xlu1 %333, %v55_v6   ;;  %v180_v29 = vld [vmem:[%s450_s3] sm:$0xff] }
  0x20   :  { %307 = vmatpush3.msra.mxu0 %v52_v2  ;;  %314 = vmatprep.subr.mxu1 %v387_v12 }
  0x21   :  { %309 = vmatmul.mubr.msk.f32.vlgmr.msra.gmra.mxu0 %vm78_vm0, %v49_v4  ;;  %322 = vmatprep.mubr.msk.f32.mxu1 %vm388_vm1, %v387_v12 }
  0x22   :  { %311 = vmatprep.mubr.msk.f32.mxu0 %vm78_vm0, %v50_v7  ;;  %70 = vperm.xlu0 %332, %v56_v8  }
  0x23   :  { %60 = vperm.xlu1 %333, %v54_v9  }
  0x25   :  { %312 = vmatmul.mubr.msk.f32.gmra.mxu0 %vm78_vm0, %v51_v10 }
  0x26   :  { %184 = vperm.xlu0 %332, %v181_v11  }
  0x99   :  { %v76_v13 = vpop.permute.xlu0 %75 }
  0x9a   :  { %v66_v14 = vpop.permute.xlu1 %65 }
  0x9d   :  { %v71_v18 = vpop.permute.xlu0 %70 }
  0x9e   :  { %v61_v20 = vpop.permute.xlu1 %60 }
  0xa1   :  { %v185_v30 = vpop.permute.xlu0 %184 }
  0xe1   :  { %v310_v15 = vpop.f32.mrf.mxu0 }
  0xe2   :  { %v163_v22 = vadd.f32 %v310_v15, %v66_v14 }
  0xe3   :  { %v157_v16 = vpop.f32.mrf.mxu0 }
  0xe4   :  { %v158_v25 = vadd.f32 %v157_v16, %v61_v20  ;;  %v177_v27 = vmax.f32 %v163_v22, 0.0 }
  0xe5   :  { %v313_v17 = vpop.f32.mrf.mxu0 }
  0xe6   :  { %v173_v19 = vadd.f32 %v313_v17, %v76_v13  ;;  %v176_v28 = vmax.f32 %v158_v25, 0.0 }
  0xe7   :  { %v167_v21 = vpop.f32.mrf.mxu0 }
  0xe8   :  { %v179_v23 = vmax.f32 %v173_v19, 0.0  ;;  %v168_v24 = vadd.f32 %v167_v21, %v71_v18 }
  0xea   :  { %v178_v26 = vmax.f32 %v168_v24, 0.0  ;;  %315 = vmatpush3.msra.mxu1 %v179_v23 }
  0xeb   :  { %316 = vmatprep.subr.mxu1 %v387_v12 }
  0xec   :  { %317 = vmatpush3.msra.mxu1 %v178_v26 }
  0xed   :  { %318 = vmatprep.subr.mxu1 %v387_v12 }
  0xee   :  { %319 = vmatpush3.msra.mxu1 %v177_v27 }
  0xef   :  { %320 = vmatprep.subr.mxu1 %v387_v12 }
  0xf0   :  { %321 = vmatpush3.msra.mxu1 %v176_v28 }
  0xf1   :  { %323 = vmatmul.mubr.msk.f32.vlgmr.msra.gmra.mxu1 %vm187_vm2, %v180_v29 }
 0x1b1   :  { %v257_v31 = vpop.f32.mrf.mxu1 }
 0x1b2   :  { %v258_v32 = vadd.f32 %v257_v31, %v185_v30 }
 0x1b3   :  { %v324_v33 = vpop.f32.mrf.mxu1 }
 0x1b4   :  { %v262_v34 = vsel %vm261_vm3, %v258_v32, -inf }
 0x1b5   :  { %v263_v35 = vrot.slane %v262_v34, 4 }
 0x1b7   :  { %v264_v36 = vmax.f32 %v262_v34, %v263_v35 }
 0x1b9   :  { %v265_v37 = vrot.slane %v264_v36, 2 }
 0x1bb   :  { %v266_v38 = vmax.f32 %v264_v36, %v265_v37 }
 0x1bd   :  { %v267_v39 = vrot.slane %v266_v38, 1 }
 0x1bf   :  { %v268_v40 = vmax.f32 %v266_v38, %v267_v39 }
 0x1c1   :  { %v269_v41 = vsub.f32 %v258_v32, %v268_v40 }
 0x1c3   :  { %v270_v42 = vmul.f32 1.442695, %v269_v41 }
 0x1c5   :  { %334 = vpow2.f32 %v270_v42 }
 0x1d2   :  { %v335_v43 = vpop.eup %334 }
 0x1d3   :  { %v272_v44 = vsel %vm261_vm3, %v335_v43, 0.0 }
 0x1d4   :  { %v273_v45 = vrot.slane %v272_v44, 4 }
 0x1d6   :  { %v274_v46 = vadd.f32 %v273_v45, %v272_v44 }
 0x1d8   :  { %v275_v47 = vrot.slane %v274_v46, 2 }
 0x1da   :  { %v276_v48 = vadd.f32 %v275_v47, %v274_v46 }
 0x1dc   :  { %v277_v49 = vrot.slane %v276_v48, 1 }
 0x1de   :  { %v278_v50 = vadd.f32 %v277_v49, %v276_v48 }
 0x1e0   :  { %336 = vrcp.f32 %v278_v50 }
 0x1ed   :  { %v337_v51 = vpop.eup %336 }
 0x1ee   :  { %v280_v52 = vmul.f32 %v337_v51, %v335_v43 }
 0x1f0   :  { %281 = vst.msk [vmem:[%s452_s5] sm:$0xff] %vm261_vm3, %v280_v52 }
 0x1f1   :  { %286 = vsyncpa [#allocation3], 1 }
 0x1f2   :  { %287 = vsyncpa [#allocation5], 1 }

</bundles_post_ra>
